<compile_context>
chip_gen: v6e
topology: v6e:2x2x1
jax: 0.10.0
libtpu: 0.0.40
codegen_flags: <defaults>
</compile_context>

<pallas_src>
import functools

import jax
import jax.numpy as jnp
from jax import lax
from jax.experimental import pallas as pl
from jax.experimental.pallas import tpu as pltpu

_VMEM_LIMIT = 32 * 1024 * 1024  # safe on v5e/v6e/v7x, above v5e's 16 MiB default


def _pick_tile(m, cap=1024):
    """Largest divisor of m that is <= cap and a multiple of 8 (fallback: m)."""
    t = min(m, cap)
    while t >= 8:
        if m % t == 0 and t % 8 == 0:
            return t
        t -= 1
    return m


# ----------------------------------------------------------------------------
# Kernel 1: 3x3 conv on padded NHWC activations.
#   - 9 shifted (H*W, Cin) x (Cin, Cout) MXU matmuls accumulated in f32
#   - fused bias + optional residual + relu
#   - writes the padded (zero-border) bf16 activation for the next layer
# ----------------------------------------------------------------------------
def _conv3x3_kernel(xp_ref, w_ref, b_ref, *rest, H, W, act, has_res):
    if has_res:
        res_ref, o_ref = rest
    else:
        (o_ref,) = rest
    cin = xp_ref.shape[-1]
    cout = o_ref.shape[-1]

    acc = jnp.zeros((H * W, cout), jnp.float32)
    for t in range(9):
        dy, dx = t // 3, t % 3
        a = xp_ref[:, dy:dy + H, dx:dx + W, :].reshape(H * W, cin)
        acc = acc + jnp.dot(a, w_ref[t], preferred_element_type=jnp.float32)
    acc = acc + b_ref[...]
    if has_res:
        res = res_ref[:, 1:1 + H, 1:1 + W, :].reshape(H * W, cout)
        acc = acc + res.astype(jnp.float32)
    if act == "relu":
        acc = jnp.maximum(acc, 0.0)

    # padded output: zero border + interior
    o_ref[...] = jnp.zeros_like(o_ref)
    o_ref[:, 1:1 + H, 1:1 + W, :] = acc.reshape(1, H, W, cout).astype(o_ref.dtype)


def conv3x3_padded(xp, w, b, act="none", res=None):
    B, Hp, Wp, Cin = xp.shape
    H, W = Hp - 2, Wp - 2
    Cout = w.shape[-1]
    has_res = res is not None

    in_specs = [
        pl.BlockSpec((1, Hp, Wp, Cin), lambda i: (i, 0, 0, 0)),
        pl.BlockSpec((9, Cin, Cout), lambda i: (0, 0, 0)),
        pl.BlockSpec((1, Cout), lambda i: (0, 0)),
    ]
    inputs = [xp, w, b]
    if has_res:
        in_specs.append(pl.BlockSpec((1, Hp, Wp, Cout), lambda i: (i, 0, 0, 0)))
        inputs.append(res)

    return pl.pallas_call(
        functools.partial(_conv3x3_kernel, H=H, W=W, act=act, has_res=has_res),
        out_shape=jax.ShapeDtypeStruct((B, Hp, Wp, Cout), jnp.bfloat16),
        grid_spec=pltpu.PrefetchScalarGridSpec(
            num_scalar_prefetch=0,
            grid=(B,),
            in_specs=in_specs,
            out_specs=pl.BlockSpec((1, Hp, Wp, Cout), lambda i: (i, 0, 0, 0)),
        ),
        compiler_params=pltpu.CompilerParams(
            dimension_semantics=("parallel",),
            vmem_limit_bytes=_VMEM_LIMIT),
    )(*inputs)


# ----------------------------------------------------------------------------
# Kernel 2: 1x1 head conv + masked channel softmax (classes padded to 128 lanes)
# ----------------------------------------------------------------------------
def _head_kernel(hp_ref, w_ref, b_ref, o_ref, *, H, W, n_valid):
    cin = hp_ref.shape[-1]
    cp = o_ref.shape[-1]
    h = hp_ref[:, 1:1 + H, 1:1 + W, :].reshape(H * W, cin)
    logits = jnp.dot(h, w_ref[...], preferred_element_type=jnp.float32) + b_ref[...]
    lane = lax.broadcasted_iota(jnp.int32, logits.shape, 1)
    logits = jnp.where(lane < n_valid, logits, jnp.float32(-1e30))
    m = jnp.max(logits, axis=-1, keepdims=True)
    e = jnp.exp(logits - m)
    probs = e / jnp.sum(e, axis=-1, keepdims=True)
    o_ref[...] = probs.reshape(1, H, W, cp).astype(o_ref.dtype)


def head_conv1x1_softmax(hp, w, b, n_valid):
    B, Hp, Wp, Cin = hp.shape
    H, W = Hp - 2, Wp - 2
    Cp = w.shape[-1]
    return pl.pallas_call(
        functools.partial(_head_kernel, H=H, W=W, n_valid=n_valid),
        out_shape=jax.ShapeDtypeStruct((B, H, W, Cp), jnp.float32),
        grid_spec=pltpu.PrefetchScalarGridSpec(
            num_scalar_prefetch=0,
            grid=(B,),
            in_specs=[
                pl.BlockSpec((1, Hp, Wp, Cin), lambda i: (i, 0, 0, 0)),
                pl.BlockSpec((Cin, Cp), lambda i: (0, 0)),
                pl.BlockSpec((1, Cp), lambda i: (0, 0)),
            ],
            out_specs=pl.BlockSpec((1, H, W, Cp), lambda i: (i, 0, 0, 0)),
        ),
        compiler_params=pltpu.CompilerParams(
            dimension_semantics=("parallel",),
            vmem_limit_bytes=_VMEM_LIMIT),
    )(hp, w, b)


# ----------------------------------------------------------------------------
# Kernel 3: mask_augment apply — per-pixel keep mask broadcast over channels.
# (Randomness is drawn with jax.random outside the kernel: deterministic,
#  tile-size independent, and works both compiled and in interpret mode.)
# ----------------------------------------------------------------------------
def _mask_kernel(x_ref, keep_ref, o_ref):
    o_ref[...] = x_ref[...] * keep_ref[...]


def mask_apply(x2d, keep):
    M, C = x2d.shape
    tm = _pick_tile(M)
    return pl.pallas_call(
        _mask_kernel,
        out_shape=jax.ShapeDtypeStruct((M, C), x2d.dtype),
        grid_spec=pltpu.PrefetchScalarGridSpec(
            num_scalar_prefetch=0,
            grid=(M // tm,),
            in_specs=[pl.BlockSpec((tm, C), lambda i: (i, 0)),
                      pl.BlockSpec((tm, 1), lambda i: (i, 0))],
            out_specs=pl.BlockSpec((tm, C), lambda i: (i, 0)),
        ),
        compiler_params=pltpu.CompilerParams(dimension_semantics=("parallel",)),
    )(x2d, keep)


# ----------------------------------------------------------------------------
# Kernel 4: consistency loss = F.cross_entropy(probs_msk, argmax(probs, 1)).
# Reads clean/masked halves of the batched head output via two index_maps on
# the SAME array (no HBM slice copies).  Each tile writes its partial sum to
# its own (8,128) output block ("parallel" grid -> both v7x TensorCores usable);
# the tiny final reduction is done in JAX.
# ----------------------------------------------------------------------------
def _ce_kernel(lg_ref, lm_ref, o_ref, *, n_valid):
    lg = lg_ref[...].astype(jnp.float32)   # clean  (tm, Cp) softmax probs
    lm = lm_ref[...].astype(jnp.float32)   # masked (tm, Cp) softmax probs
    cp = lg.shape[-1]
    lane = lax.broadcasted_iota(jnp.int32, lg.shape, 1)
    valid = lane < n_valid
    neg = jnp.float32(-1e30)
    lg = jnp.where(valid, lg, neg)
    lm = jnp.where(valid, lm, neg)

    # argmax over valid classes (first maximal index) -> target
    mx = jnp.max(lg, axis=-1, keepdims=True)
    tgt = jnp.min(jnp.where(lg >= mx, lane, cp), axis=-1, keepdims=True)  # (tm, 1)

    # cross entropy (log-softmax over valid lanes) of masked probs vs target
    m = jnp.max(lm, axis=-1, keepdims=True)
    lse = m + jnp.log(jnp.sum(jnp.exp(lm - m), axis=-1, keepdims=True))   # (tm, 1)
    picked = jnp.sum(jnp.where(lane == tgt, lm, 0.0), axis=-1, keepdims=True)
    partial = jnp.sum(lse - picked, axis=0, keepdims=True)                # (1, 1)
    o_ref[...] = jnp.broadcast_to(partial.reshape(1, 1, 1), o_ref.shape)


def cross_entropy_argmax(probs2d, m_half, n_valid):
    M2, Cp = probs2d.shape
    assert M2 == 2 * m_half
    tm = _pick_tile(m_half)
    assert m_half % tm == 0 and tm % 8 == 0, (m_half, tm)
    g = m_half // tm
    partials = pl.pallas_call(
        functools.partial(_ce_kernel, n_valid=n_valid),
        out_shape=jax.ShapeDtypeStruct((g, 8, 128), jnp.float32),
        grid_spec=pltpu.PrefetchScalarGridSpec(
            num_scalar_prefetch=0,
            grid=(g,),
            in_specs=[
                pl.BlockSpec((tm, Cp), lambda i: (i, 0)),       # clean half
                pl.BlockSpec((tm, Cp), lambda i: (i + g, 0)),   # masked half
            ],
            out_specs=pl.BlockSpec((1, 8, 128), lambda i: (i, 0, 0)),
        ),
        compiler_params=pltpu.CompilerParams(dimension_semantics=("parallel",)),
    )(probs2d, probs2d)
    return jnp.sum(partials[:, 0, 0]) / jnp.float32(m_half)


# ----------------------------------------------------------------------------
# Parameters (bf16 weights, f32 biases; head padded to 128 class lanes)
# ----------------------------------------------------------------------------
def init_params(key, input_nc, num_classes, ngf, n_blocks, num_classes_padded=128):
    def conv_w(k, cin, cout):
        w = jax.random.normal(k, (9, cin, cout), jnp.float32) * (1.0 / (9 * cin) ** 0.5)
        return w.astype(jnp.bfloat16), jnp.zeros((1, cout), jnp.float32)

    keys = jax.random.split(key, 2 + 2 * n_blocks)
    params = {"num_classes": num_classes}
    params["stem_w"], params["stem_b"] = conv_w(keys[0], input_nc, ngf)
    blocks = []
    for bi in range(n_blocks):
        w1, b1 = conv_w(keys[1 + 2 * bi], ngf, ngf)
        w2, b2 = conv_w(keys[2 + 2 * bi], ngf, ngf)
        blocks.append({"w1": w1, "b1": b1, "w2": w2, "b2": b2})
    params["blocks"] = blocks
    hw = jax.random.normal(keys[-1], (ngf, num_classes), jnp.float32) * (1.0 / ngf ** 0.5)
    hw = jnp.pad(hw, ((0, 0), (0, num_classes_padded - num_classes)))
    params["head_w"] = hw.astype(jnp.bfloat16)
    params["head_b"] = jnp.zeros((1, num_classes_padded), jnp.float32)
    return params


def ae_resnet_encoder_padded(xbp, params):
    """xbp: (B, H+2, W+2, Cin) bf16 padded NHWC -> (B, H, W, Cp) f32 softmax probs."""
    hp = conv3x3_padded(xbp, params["stem_w"], params["stem_b"], act="relu")
    for blk in params["blocks"]:
        yp = conv3x3_padded(hp, blk["w1"], blk["b1"], act="relu")
        hp = conv3x3_padded(yp, blk["w2"], blk["b2"], act="none", res=hp)
    return head_conv1x1_softmax(hp, params["head_w"], params["head_b"],
                                n_valid=params["num_classes"])


# ----------------------------------------------------------------------------
# Full forward: clean + masked inputs batched into ONE 2N encoder pass.
# ----------------------------------------------------------------------------
def semantic_consistency_forward(x_nchw, params, drop_rate=0.9,
                                 mask_key=jax.random.PRNGKey(0), vis=False):
    N, C, H, W = x_nchw.shape
    num_classes = params["num_classes"]
    x_nhwc = jnp.transpose(x_nchw, (0, 2, 3, 1))

    # mask_augment: per-pixel Bernoulli(1-drop_rate) keep mask, shared over channels
    keep = jax.random.bernoulli(mask_key, 1.0 - drop_rate,
                                (N * H * W, 1)).astype(x_nhwc.dtype)
    x_drop_nhwc = mask_apply(x_nhwc.reshape(N * H * W, C), keep).reshape(N, H, W, C)

    # single batched (2N) encoder pass on padded bf16 activations
    xb = jnp.concatenate([x_nhwc, x_drop_nhwc], axis=0).astype(jnp.bfloat16)
    xbp = jnp.pad(xb, ((0, 0), (1, 1), (1, 1), (0, 0)))
    probs = ae_resnet_encoder_padded(xbp, params)          # (2N, H, W, Cp) f32

    logits = jnp.transpose(probs[:N, :, :, :num_classes], (0, 3, 1, 2))
    if vis:
        logits_msk = jnp.transpose(probs[N:, :, :, :num_classes], (0, 3, 1, 2))
        x_drop = jnp.transpose(x_drop_nhwc, (0, 3, 1, 2))
        return logits, logits_msk, x_drop

    probs2d = probs.reshape(2 * N * H * W, probs.shape[-1])
    consistency = cross_entropy_argmax(probs2d, N * H * W, num_classes)
    return logits, consistency


if __name__ == "__main__":
    key = jax.random.PRNGKey(0)
    kx, kp, km = jax.random.split(key, 3)

    # small shapes consistent with the module (input_nc=3, num_classes=21, ngf=64)
    N, input_nc, H, W = 2, 3, 16, 16
    num_classes, ngf, n_blocks = 21, 64, 2
    drop_rate = 0.9

    x = jax.random.normal(kx, (N, input_nc, H, W), jnp.float32)
    params = init_params(kp, input_nc, num_classes, ngf, n_blocks)

    logits, consistency = semantic_consistency_forward(
        x, params, drop_rate=drop_rate, mask_key=km)
    jax.block_until_ready((logits, consistency))

    assert logits.shape == (N, num_classes, H, W)
    assert consistency.shape == ()
    assert bool(jnp.isfinite(consistency))
    print("KERNEL_OK")
</pallas_src>

<mosaic_0001>
module attributes {stable_mosaic.version = 11 : i64} {
  func.func @_mask_kernel(%arg0: i32, %arg1: memref<512x3xf32, #tpu.memory_space<vmem>>, %arg2: memref<512x1xf32, #tpu.memory_space<vmem>>, %arg3: memref<512x3xf32, #tpu.memory_space<vmem>>) attributes {dimension_semantics = [#tpu.dimension_semantics<parallel>], iteration_bounds = array<i64: 1>, scalar_prefetch = 0 : i64, scratch_operands = 0 : i64, tpu.core_type = #tpu.core_type<tc>, window_params = [{transform_indices = @transform_0, window_bounds = array<i64: 512, 3>}, {transform_indices = @transform_1, window_bounds = array<i64: 512, 1>}, {transform_indices = @transform_2, window_bounds = array<i64: 512, 3>}]} {
    %c0 = arith.constant 0 : index
    %c0_0 = arith.constant 0 : index
    %0 = vector.load %arg1[%c0, %c0_0] : memref<512x3xf32, #tpu.memory_space<vmem>>, vector<512x3xf32>
    %c0_1 = arith.constant 0 : index
    %c0_2 = arith.constant 0 : index
    %1 = vector.load %arg2[%c0_1, %c0_2] : memref<512x1xf32, #tpu.memory_space<vmem>>, vector<512x1xf32>
    %2 = vector.broadcast %1 : vector<512x1xf32> to vector<512x3xf32>
    %3 = arith.mulf %0, %2 : vector<512x3xf32>
    %c0_3 = arith.constant 0 : index
    %c0_4 = arith.constant 0 : index
    %4 = vector.load %arg3[%c0_3, %c0_4] : memref<512x3xf32, #tpu.memory_space<vmem>>, vector<512x3xf32>
    tpu.vector_store %arg3[%c0_3, %c0_4], %3 {strides = array<i32>} : memref<512x3xf32, #tpu.memory_space<vmem>>, vector<512x3xf32>,
    return
  }
  func.func @transform_0(%arg0: i32) -> (i32, i32) {
    %c0_i32 = arith.constant 0 : i32
    %c0_i32_0 = arith.constant 0 : i32
    return %arg0, %c0_i32 : i32, i32
  }
  func.func @transform_1(%arg0: i32) -> (i32, i32) {
    %c0_i32 = arith.constant 0 : i32
    %c0_i32_0 = arith.constant 0 : i32
    return %arg0, %c0_i32 : i32, i32
  }
  func.func @transform_2(%arg0: i32) -> (i32, i32) {
    %c0_i32 = arith.constant 0 : i32
    %c0_i32_0 = arith.constant 0 : i32
    return %arg0, %c0_i32 : i32, i32
  }
}

</mosaic_0001>

<bundles_post_ra>
// kernel: tpu_custom_call.1
= control target key start
LH: loop header
LB: loop body
LE: loop exit
PB: predicated region body
PF: predicated region fallthrough
CT: control target
= control target key end

     0   :  { %v595_v0 = vmov 0   ;;  %vm523_vm0 = vcmask 23552   ;;  %s1251_s1 = inlined_call_operand.vmem [shape: f32[512,1], index: 1, kind: input, shape index: {}]   ;;  %s1252_s0 = inlined_call_operand.vmem [shape: f32[512,3], index: 0, kind: input, shape index: {}]   ;;  %s1253_s2 = inlined_call_operand.vmem [shape: f32[512,3], index: 2, kind: output, shape index: {}]  }
   0x1   :  { %594 = vset.pattern.permute.xlu1 %v595_v0  ;;  %593 = vset.pattern.permute.xlu0 %v595_v0  ;;  %v77_v1 = vld [vmem:[%s1251_s1 + $0x10] sm:$0xff]  ;;  %v75_v2 = vld [vmem:[%s1251_s1] sm:$0xff]  ;;  %v78_v3 = vld [vmem:[%s1251_s1 + $0x18] sm:$0xff] }
   0x2   :  { %151 = vperm.xlu1 %594, %v77_v1   ;;  %141 = vperm.xlu0 %593, %v75_v2   ;;  %v76_v4 = vld [vmem:[%s1251_s1 + $0x8] sm:$0xff]  ;;  %v79_v6 = vld [vmem:[%s1251_s1 + $0x20] sm:$0xff]  ;;  %v82_v7 = vld [vmem:[%s1251_s1 + $0x38] sm:$0xff] }
   0x3   :  { %v80_v5 = vld [vmem:[%s1251_s1 + $0x28] sm:$0xff]  ;;  %v81_v8 = vld [vmem:[%s1251_s1 + $0x30] sm:$0xff]  ;;  %v83_v10 = vld [vmem:[%s1251_s1 + $0x40] sm:$0xff] }
   0x4   :  { %v84_v9 = vld [vmem:[%s1251_s1 + $0x48] sm:$0xff]  ;;  %v86_v11 = vld [vmem:[%s1251_s1 + $0x58] sm:$0xff]  ;;  %v85_v12 = vld [vmem:[%s1251_s1 + $0x50] sm:$0xff] }
   0x5   :  { %v88_v13 = vld [vmem:[%s1251_s1 + $0x68] sm:$0xff]  ;;  %v87_v14 = vld [vmem:[%s1251_s1 + $0x60] sm:$0xff]  ;;  %v90_v15 = vld [vmem:[%s1251_s1 + $0x78] sm:$0xff] }
   0x6   :  { %156 = vperm.xlu1 %594, %v78_v3   ;;  %146 = vperm.xlu0 %593, %v76_v4   ;;  %v89_v16 = vld [vmem:[%s1251_s1 + $0x70] sm:$0xff]  ;;  %v92_v17 = vld [vmem:[%s1251_s1 + $0x88] sm:$0xff]  ;;  %v91_v18 = vld [vmem:[%s1251_s1 + $0x80] sm:$0xff] }
   0x7   :  { %v94_v19 = vld [vmem:[%s1251_s1 + $0x98] sm:$0xff]  ;;  %v93_v20 = vld [vmem:[%s1251_s1 + $0x90] sm:$0xff]  ;;  %v96_v21 = vld [vmem:[%s1251_s1 + $0xa8] sm:$0xff] }
   0x8   :  { %v95_v22 = vld [vmem:[%s1251_s1 + $0xa0] sm:$0xff]  ;;  %v98_v23 = vld [vmem:[%s1251_s1 + $0xb8] sm:$0xff]  ;;  %v97_v24 = vld [vmem:[%s1251_s1 + $0xb0] sm:$0xff] }
   0x9   :  { %v100_v25 = vld [vmem:[%s1251_s1 + $0xc8] sm:$0xff]  ;;  %v99_v26 = vld [vmem:[%s1251_s1 + $0xc0] sm:$0xff]  ;;  %v102_v27 = vld [vmem:[%s1251_s1 + $0xd8] sm:$0xff] }
   0xa   :  { %166 = vperm.xlu1 %594, %v80_v5   ;;  %161 = vperm.xlu0 %593, %v79_v6   ;;  %v101_v28 = vld [vmem:[%s1251_s1 + $0xd0] sm:$0xff]  ;;  %v104_v29 = vld [vmem:[%s1251_s1 + $0xe8] sm:$0xff]  ;;  %v103_v30 = vld [vmem:[%s1251_s1 + $0xe0] sm:$0xff] }
   0xb   :  { %v106_v31 = vld [vmem:[%s1251_s1 + $0xf8] sm:$0xff]  ;;  %v105_v32 = vld [vmem:[%s1251_s1 + $0xf0] sm:$0xff]  ;;  %v108_v33 = vld [vmem:[%s1251_s1 + $0x108] sm:$0xff] }
   0xc   :  { %v107_v34 = vld [vmem:[%s1251_s1 + $0x100] sm:$0xff]  ;;  %v110_v35 = vld [vmem:[%s1251_s1 + $0x118] sm:$0xff]  ;;  %v109_v36 = vld [vmem:[%s1251_s1 + $0x110] sm:$0xff] }
   0xd   :  { %v112_v37 = vld [vmem:[%s1251_s1 + $0x128] sm:$0xff]  ;;  %v111_v38 = vld [vmem:[%s1251_s1 + $0x120] sm:$0xff]  ;;  %v114_v39 = vld [vmem:[%s1251_s1 + $0x138] sm:$0xff] }
   0xe   :  { %176 = vperm.xlu1 %594, %v82_v7   ;;  %171 = vperm.xlu0 %593, %v81_v8   ;;  %v113_v40 = vld [vmem:[%s1251_s1 + $0x130] sm:$0xff]  ;;  %v116_v41 = vld [vmem:[%s1251_s1 + $0x148] sm:$0xff]  ;;  %v115_v42 = vld [vmem:[%s1251_s1 + $0x140] sm:$0xff] }
   0xf   :  { %v118_v43 = vld [vmem:[%s1251_s1 + $0x158] sm:$0xff]  ;;  %v117_v44 = vld [vmem:[%s1251_s1 + $0x150] sm:$0xff]  ;;  %v120_v45 = vld [vmem:[%s1251_s1 + $0x168] sm:$0xff] }
  0x10   :  { %v119_v46 = vld [vmem:[%s1251_s1 + $0x160] sm:$0xff]  ;;  %v122_v47 = vld [vmem:[%s1251_s1 + $0x178] sm:$0xff]  ;;  %v121_v48 = vld [vmem:[%s1251_s1 + $0x170] sm:$0xff] }
  0x11   :  { %v124_v49 = vld [vmem:[%s1251_s1 + $0x188] sm:$0xff]  ;;  %v123_v50 = vld [vmem:[%s1251_s1 + $0x180] sm:$0xff]  ;;  %v126_v51 = vld [vmem:[%s1251_s1 + $0x198] sm:$0xff] }
  0x12   :  { %186 = vperm.xlu1 %594, %v84_v9   ;;  %181 = vperm.xlu0 %593, %v83_v10   ;;  %v125_v52 = vld [vmem:[%s1251_s1 + $0x190] sm:$0xff]  ;;  %v128_v53 = vld [vmem:[%s1251_s1 + $0x1a8] sm:$0xff]  ;;  %v127_v54 = vld [vmem:[%s1251_s1 + $0x1a0] sm:$0xff] }
  0x13   :  { %v130_v55 = vld [vmem:[%s1251_s1 + $0x1b8] sm:$0xff]  ;;  %v129_v56 = vld [vmem:[%s1251_s1 + $0x1b0] sm:$0xff]  ;;  %v132_v57 = vld [vmem:[%s1251_s1 + $0x1c8] sm:$0xff] }
  0x14   :  { %v131_v58 = vld [vmem:[%s1251_s1 + $0x1c0] sm:$0xff]  ;;  %v134_v59 = vld [vmem:[%s1251_s1 + $0x1d8] sm:$0xff]  ;;  %v133_v60 = vld [vmem:[%s1251_s1 + $0x1d0] sm:$0xff] }
  0x15   :  { %v136_v61 = vld [vmem:[%s1251_s1 + $0x1e8] sm:$0xff]  ;;  %v135_v62 = vld [vmem:[%s1251_s1 + $0x1e0] sm:$0xff]  ;;  %v13_v63 = vld [vmem:[%s1252_s0 + $0x10] sm:$0xff] }
  0x16   :  { %196 = vperm.xlu1 %594, %v86_v11   ;;  %191 = vperm.xlu0 %593, %v85_v12   ;;  %v11_v0 = vld [vmem:[%s1252_s0] sm:$0xff]  ;;  %v138_v1 = vld [vmem:[%s1251_s1 + $0x1f8] sm:$0xff]  ;;  %v137_v2 = vld [vmem:[%s1251_s1 + $0x1f0] sm:$0xff] }
  0x17   :  { %v14_v7 = vld [vmem:[%s1252_s0 + $0x18] sm:$0xff]  ;;  %v12_v8 = vld [vmem:[%s1252_s0 + $0x8] sm:$0xff] }
  0x1a   :  { %206 = vperm.xlu1 %594, %v88_v13   ;;  %201 = vperm.xlu0 %593, %v87_v14   ;;  %v16_v13 = vld [vmem:[%s1252_s0 + $0x28] sm:$0xff]  ;;  %v15_v14 = vld [vmem:[%s1252_s0 + $0x20] sm:$0xff] }
  0x1e   :  { %216 = vperm.xlu1 %594, %v90_v15   ;;  %211 = vperm.xlu0 %593, %v89_v16  }
  0x22   :  { %226 = vperm.xlu1 %594, %v92_v17   ;;  %221 = vperm.xlu0 %593, %v91_v18  }
  0x26   :  { %236 = vperm.xlu1 %594, %v94_v19   ;;  %231 = vperm.xlu0 %593, %v93_v20   ;;  %v18_v19 = vld [vmem:[%s1252_s0 + $0x38] sm:$0xff]  ;;  %v17_v20 = vld [vmem:[%s1252_s0 + $0x30] sm:$0xff] }
  0x2a   :  { %246 = vperm.xlu1 %594, %v96_v21   ;;  %241 = vperm.xlu0 %593, %v95_v22  }
  0x2e   :  { %256 = vperm.xlu1 %594, %v98_v23   ;;  %251 = vperm.xlu0 %593, %v97_v24  }
  0x32   :  { %266 = vperm.xlu1 %594, %v100_v25   ;;  %261 = vperm.xlu0 %593, %v99_v26   ;;  %v20_v25 = vld [vmem:[%s1252_s0 + $0x48] sm:$0xff]  ;;  %v19_v26 = vld [vmem:[%s1252_s0 + $0x40] sm:$0xff] }
  0x36   :  { %276 = vperm.xlu1 %594, %v102_v27   ;;  %271 = vperm.xlu0 %593, %v101_v28  }
  0x3a   :  { %286 = vperm.xlu1 %594, %v104_v29   ;;  %281 = vperm.xlu0 %593, %v103_v30  }
  0x3e   :  { %296 = vperm.xlu1 %594, %v106_v31   ;;  %291 = vperm.xlu0 %593, %v105_v32   ;;  %v22_v31 = vld [vmem:[%s1252_s0 + $0x58] sm:$0xff]  ;;  %v21_v32 = vld [vmem:[%s1252_s0 + $0x50] sm:$0xff] }
  0x42   :  { %306 = vperm.xlu1 %594, %v108_v33   ;;  %301 = vperm.xlu0 %593, %v107_v34  }
  0x46   :  { %316 = vperm.xlu1 %594, %v110_v35   ;;  %311 = vperm.xlu0 %593, %v109_v36  }
  0x4a   :  { %326 = vperm.xlu1 %594, %v112_v37   ;;  %321 = vperm.xlu0 %593, %v111_v38   ;;  %v24_v37 = vld [vmem:[%s1252_s0 + $0x68] sm:$0xff]  ;;  %v23_v38 = vld [vmem:[%s1252_s0 + $0x60] sm:$0xff] }
  0x4e   :  { %336 = vperm.xlu1 %594, %v114_v39   ;;  %331 = vperm.xlu0 %593, %v113_v40  }
  0x52   :  { %346 = vperm.xlu1 %594, %v116_v41   ;;  %341 = vperm.xlu0 %593, %v115_v42  }
  0x56   :  { %356 = vperm.xlu1 %594, %v118_v43   ;;  %351 = vperm.xlu0 %593, %v117_v44   ;;  %v26_v43 = vld [vmem:[%s1252_s0 + $0x78] sm:$0xff]  ;;  %v25_v44 = vld [vmem:[%s1252_s0 + $0x70] sm:$0xff] }
  0x5a   :  { %366 = vperm.xlu1 %594, %v120_v45   ;;  %361 = vperm.xlu0 %593, %v119_v46  }
  0x5e   :  { %376 = vperm.xlu1 %594, %v122_v47   ;;  %371 = vperm.xlu0 %593, %v121_v48  }
  0x62   :  { %386 = vperm.xlu1 %594, %v124_v49   ;;  %381 = vperm.xlu0 %593, %v123_v50   ;;  %v28_v49 = vld [vmem:[%s1252_s0 + $0x88] sm:$0xff]  ;;  %v27_v50 = vld [vmem:[%s1252_s0 + $0x80] sm:$0xff] }
  0x66   :  { %396 = vperm.xlu1 %594, %v126_v51   ;;  %391 = vperm.xlu0 %593, %v125_v52  }
  0x6a   :  { %406 = vperm.xlu1 %594, %v128_v53   ;;  %401 = vperm.xlu0 %593, %v127_v54  }
  0x6e   :  { %416 = vperm.xlu1 %594, %v130_v55   ;;  %411 = vperm.xlu0 %593, %v129_v56   ;;  %v30_v55 = vld [vmem:[%s1252_s0 + $0x98] sm:$0xff]  ;;  %v29_v56 = vld [vmem:[%s1252_s0 + $0x90] sm:$0xff] }
  0x72   :  { %426 = vperm.xlu1 %594, %v132_v57   ;;  %421 = vperm.xlu0 %593, %v131_v58  }
  0x76   :  { %436 = vperm.xlu1 %594, %v134_v59   ;;  %431 = vperm.xlu0 %593, %v133_v60  }
  0x7a   :  { %446 = vperm.xlu1 %594, %v136_v61   ;;  %441 = vperm.xlu0 %593, %v135_v62   ;;  %v32_v61 = vld [vmem:[%s1252_s0 + $0xa8] sm:$0xff]  ;;  %v31_v62 = vld [vmem:[%s1252_s0 + $0xa0] sm:$0xff] }
  0x7d   :  { %v152_v3 = vpop.permute.xlu1 %151  ;;  %v142_v4 = vpop.permute.xlu0 %141 }
  0x7e   :  { %v461_v5 = vmul.f32 %v152_v3, %v13_v63  ;;  %v459_v6 = vmul.f32 %v142_v4, %v11_v0  ;;  %456 = vperm.xlu1 %594, %v138_v1   ;;  %451 = vperm.xlu0 %593, %v137_v2   ;;  %v34_v3 = vld [vmem:[%s1252_s0 + $0xb8] sm:$0xff]  ;;  %v33_v4 = vld [vmem:[%s1252_s0 + $0xb0] sm:$0xff] }
  0x80   :  { %526 = vst.msk [vmem:[%s1253_s2 + $0x10] sm:$0xff] %vm523_vm0, %v461_v5  ;;  %524 = vst.msk [vmem:[%s1253_s2] sm:$0xff] %vm523_vm0, %v459_v6 }
  0x81   :  { %v157_v9 = vpop.permute.xlu1 %156  ;;  %v147_v10 = vpop.permute.xlu0 %146 }
  0x82   :  { %v462_v11 = vmul.f32 %v157_v9, %v14_v7  ;;  %v460_v12 = vmul.f32 %v147_v10, %v12_v8  ;;  %v36_v9 = vld [vmem:[%s1252_s0 + $0xc8] sm:$0xff]  ;;  %v35_v10 = vld [vmem:[%s1252_s0 + $0xc0] sm:$0xff] }
  0x84   :  { %527 = vst.msk [vmem:[%s1253_s2 + $0x18] sm:$0xff] %vm523_vm0, %v462_v11  ;;  %525 = vst.msk [vmem:[%s1253_s2 + $0x8] sm:$0xff] %vm523_vm0, %v460_v12 }
  0x85   :  { %v167_v15 = vpop.permute.xlu1 %166  ;;  %v162_v16 = vpop.permute.xlu0 %161 }
  0x86   :  { %v464_v17 = vmul.f32 %v167_v15, %v16_v13  ;;  %v463_v18 = vmul.f32 %v162_v16, %v15_v14  ;;  %v38_v15 = vld [vmem:[%s1252_s0 + $0xd8] sm:$0xff]  ;;  %v37_v16 = vld [vmem:[%s1252_s0 + $0xd0] sm:$0xff] }
  0x88   :  { %529 = vst.msk [vmem:[%s1253_s2 + $0x28] sm:$0xff] %vm523_vm0, %v464_v17  ;;  %528 = vst.msk [vmem:[%s1253_s2 + $0x20] sm:$0xff] %vm523_vm0, %v463_v18 }
  0x89   :  { %v177_v21 = vpop.permute.xlu1 %176  ;;  %v172_v22 = vpop.permute.xlu0 %171 }
  0x8a   :  { %v466_v23 = vmul.f32 %v177_v21, %v18_v19  ;;  %v465_v24 = vmul.f32 %v172_v22, %v17_v20  ;;  %v40_v21 = vld [vmem:[%s1252_s0 + $0xe8] sm:$0xff]  ;;  %v39_v22 = vld [vmem:[%s1252_s0 + $0xe0] sm:$0xff] }
  0x8c   :  { %531 = vst.msk [vmem:[%s1253_s2 + $0x38] sm:$0xff] %vm523_vm0, %v466_v23  ;;  %530 = vst.msk [vmem:[%s1253_s2 + $0x30] sm:$0xff] %vm523_vm0, %v465_v24 }
  0x8d   :  { %v187_v27 = vpop.permute.xlu1 %186  ;;  %v182_v28 = vpop.permute.xlu0 %181 }
  0x8e   :  { %v468_v29 = vmul.f32 %v187_v27, %v20_v25  ;;  %v467_v30 = vmul.f32 %v182_v28, %v19_v26  ;;  %v42_v27 = vld [vmem:[%s1252_s0 + $0xf8] sm:$0xff]  ;;  %v41_v28 = vld [vmem:[%s1252_s0 + $0xf0] sm:$0xff] }
  0x90   :  { %533 = vst.msk [vmem:[%s1253_s2 + $0x48] sm:$0xff] %vm523_vm0, %v468_v29  ;;  %532 = vst.msk [vmem:[%s1253_s2 + $0x40] sm:$0xff] %vm523_vm0, %v467_v30 }
  0x91   :  { %v197_v33 = vpop.permute.xlu1 %196  ;;  %v192_v34 = vpop.permute.xlu0 %191 }
  0x92   :  { %v470_v35 = vmul.f32 %v197_v33, %v22_v31  ;;  %v469_v36 = vmul.f32 %v192_v34, %v21_v32  ;;  %v44_v33 = vld [vmem:[%s1252_s0 + $0x108] sm:$0xff]  ;;  %v43_v34 = vld [vmem:[%s1252_s0 + $0x100] sm:$0xff] }
  0x94   :  { %535 = vst.msk [vmem:[%s1253_s2 + $0x58] sm:$0xff] %vm523_vm0, %v470_v35  ;;  %534 = vst.msk [vmem:[%s1253_s2 + $0x50] sm:$0xff] %vm523_vm0, %v469_v36 }
  0x95   :  { %v207_v39 = vpop.permute.xlu1 %206  ;;  %v202_v40 = vpop.permute.xlu0 %201 }
  0x96   :  { %v472_v41 = vmul.f32 %v207_v39, %v24_v37  ;;  %v471_v42 = vmul.f32 %v202_v40, %v23_v38  ;;  %v46_v39 = vld [vmem:[%s1252_s0 + $0x118] sm:$0xff]  ;;  %v45_v40 = vld [vmem:[%s1252_s0 + $0x110] sm:$0xff] }
  0x98   :  { %537 = vst.msk [vmem:[%s1253_s2 + $0x68] sm:$0xff] %vm523_vm0, %v472_v41  ;;  %536 = vst.msk [vmem:[%s1253_s2 + $0x60] sm:$0xff] %vm523_vm0, %v471_v42 }
  0x99   :  { %v217_v45 = vpop.permute.xlu1 %216  ;;  %v212_v46 = vpop.permute.xlu0 %211 }
  0x9a   :  { %v474_v47 = vmul.f32 %v217_v45, %v26_v43  ;;  %v473_v48 = vmul.f32 %v212_v46, %v25_v44  ;;  %v48_v45 = vld [vmem:[%s1252_s0 + $0x128] sm:$0xff]  ;;  %v47_v46 = vld [vmem:[%s1252_s0 + $0x120] sm:$0xff] }
  0x9c   :  { %539 = vst.msk [vmem:[%s1253_s2 + $0x78] sm:$0xff] %vm523_vm0, %v474_v47  ;;  %538 = vst.msk [vmem:[%s1253_s2 + $0x70] sm:$0xff] %vm523_vm0, %v473_v48 }
  0x9d   :  { %v227_v51 = vpop.permute.xlu1 %226  ;;  %v222_v52 = vpop.permute.xlu0 %221 }
  0x9e   :  { %v476_v53 = vmul.f32 %v227_v51, %v28_v49  ;;  %v475_v54 = vmul.f32 %v222_v52, %v27_v50  ;;  %v50_v51 = vld [vmem:[%s1252_s0 + $0x138] sm:$0xff]  ;;  %v49_v52 = vld [vmem:[%s1252_s0 + $0x130] sm:$0xff] }
  0xa0   :  { %541 = vst.msk [vmem:[%s1253_s2 + $0x88] sm:$0xff] %vm523_vm0, %v476_v53  ;;  %540 = vst.msk [vmem:[%s1253_s2 + $0x80] sm:$0xff] %vm523_vm0, %v475_v54 }
  0xa1   :  { %v237_v57 = vpop.permute.xlu1 %236  ;;  %v232_v58 = vpop.permute.xlu0 %231 }
  0xa2   :  { %v478_v59 = vmul.f32 %v237_v57, %v30_v55  ;;  %v477_v60 = vmul.f32 %v232_v58, %v29_v56  ;;  %v52_v57 = vld [vmem:[%s1252_s0 + $0x148] sm:$0xff]  ;;  %v51_v58 = vld [vmem:[%s1252_s0 + $0x140] sm:$0xff] }
  0xa4   :  { %543 = vst.msk [vmem:[%s1253_s2 + $0x98] sm:$0xff] %vm523_vm0, %v478_v59  ;;  %542 = vst.msk [vmem:[%s1253_s2 + $0x90] sm:$0xff] %vm523_vm0, %v477_v60 }
  0xa5   :  { %v247_v63 = vpop.permute.xlu1 %246  ;;  %v242_v0 = vpop.permute.xlu0 %241 }
  0xa6   :  { %v480_v1 = vmul.f32 %v247_v63, %v32_v61  ;;  %v479_v2 = vmul.f32 %v242_v0, %v31_v62  ;;  %v54_v63 = vld [vmem:[%s1252_s0 + $0x158] sm:$0xff]  ;;  %v53_v0 = vld [vmem:[%s1252_s0 + $0x150] sm:$0xff] }
  0xa8   :  { %545 = vst.msk [vmem:[%s1253_s2 + $0xa8] sm:$0xff] %vm523_vm0, %v480_v1  ;;  %544 = vst.msk [vmem:[%s1253_s2 + $0xa0] sm:$0xff] %vm523_vm0, %v479_v2 }
  0xa9   :  { %v257_v5 = vpop.permute.xlu1 %256  ;;  %v252_v6 = vpop.permute.xlu0 %251 }
  0xaa   :  { %v482_v7 = vmul.f32 %v257_v5, %v34_v3  ;;  %v481_v8 = vmul.f32 %v252_v6, %v33_v4  ;;  %v56_v5 = vld [vmem:[%s1252_s0 + $0x168] sm:$0xff]  ;;  %v55_v6 = vld [vmem:[%s1252_s0 + $0x160] sm:$0xff] }
  0xac   :  { %547 = vst.msk [vmem:[%s1253_s2 + $0xb8] sm:$0xff] %vm523_vm0, %v482_v7  ;;  %546 = vst.msk [vmem:[%s1253_s2 + $0xb0] sm:$0xff] %vm523_vm0, %v481_v8 }
  0xad   :  { %v267_v11 = vpop.permute.xlu1 %266  ;;  %v262_v12 = vpop.permute.xlu0 %261 }
  0xae   :  { %v484_v13 = vmul.f32 %v267_v11, %v36_v9  ;;  %v483_v14 = vmul.f32 %v262_v12, %v35_v10  ;;  %v58_v11 = vld [vmem:[%s1252_s0 + $0x178] sm:$0xff]  ;;  %v57_v12 = vld [vmem:[%s1252_s0 + $0x170] sm:$0xff] }
  0xb0   :  { %549 = vst.msk [vmem:[%s1253_s2 + $0xc8] sm:$0xff] %vm523_vm0, %v484_v13  ;;  %548 = vst.msk [vmem:[%s1253_s2 + $0xc0] sm:$0xff] %vm523_vm0, %v483_v14 }
  0xb1   :  { %v277_v17 = vpop.permute.xlu1 %276  ;;  %v272_v18 = vpop.permute.xlu0 %271 }
  0xb2   :  { %v486_v19 = vmul.f32 %v277_v17, %v38_v15  ;;  %v485_v20 = vmul.f32 %v272_v18, %v37_v16  ;;  %v60_v17 = vld [vmem:[%s1252_s0 + $0x188] sm:$0xff]  ;;  %v59_v18 = vld [vmem:[%s1252_s0 + $0x180] sm:$0xff] }
  0xb4   :  { %551 = vst.msk [vmem:[%s1253_s2 + $0xd8] sm:$0xff] %vm523_vm0, %v486_v19  ;;  %550 = vst.msk [vmem:[%s1253_s2 + $0xd0] sm:$0xff] %vm523_vm0, %v485_v20 }
  0xb5   :  { %v287_v23 = vpop.permute.xlu1 %286  ;;  %v282_v24 = vpop.permute.xlu0 %281 }
  0xb6   :  { %v488_v25 = vmul.f32 %v287_v23, %v40_v21  ;;  %v487_v26 = vmul.f32 %v282_v24, %v39_v22  ;;  %v62_v23 = vld [vmem:[%s1252_s0 + $0x198] sm:$0xff]  ;;  %v61_v24 = vld [vmem:[%s1252_s0 + $0x190] sm:$0xff] }
  0xb8   :  { %553 = vst.msk [vmem:[%s1253_s2 + $0xe8] sm:$0xff] %vm523_vm0, %v488_v25  ;;  %552 = vst.msk [vmem:[%s1253_s2 + $0xe0] sm:$0xff] %vm523_vm0, %v487_v26 }
  0xb9   :  { %v297_v29 = vpop.permute.xlu1 %296  ;;  %v292_v30 = vpop.permute.xlu0 %291 }
  0xba   :  { %v490_v31 = vmul.f32 %v297_v29, %v42_v27  ;;  %v489_v32 = vmul.f32 %v292_v30, %v41_v28  ;;  %v64_v29 = vld [vmem:[%s1252_s0 + $0x1a8] sm:$0xff]  ;;  %v63_v30 = vld [vmem:[%s1252_s0 + $0x1a0] sm:$0xff] }
  0xbc   :  { %555 = vst.msk [vmem:[%s1253_s2 + $0xf8] sm:$0xff] %vm523_vm0, %v490_v31  ;;  %554 = vst.msk [vmem:[%s1253_s2 + $0xf0] sm:$0xff] %vm523_vm0, %v489_v32 }
  0xbd   :  { %v307_v35 = vpop.permute.xlu1 %306  ;;  %v302_v36 = vpop.permute.xlu0 %301 }
  0xbe   :  { %v492_v37 = vmul.f32 %v307_v35, %v44_v33  ;;  %v491_v38 = vmul.f32 %v302_v36, %v43_v34  ;;  %v66_v35 = vld [vmem:[%s1252_s0 + $0x1b8] sm:$0xff]  ;;  %v65_v36 = vld [vmem:[%s1252_s0 + $0x1b0] sm:$0xff] }
  0xc0   :  { %557 = vst.msk [vmem:[%s1253_s2 + $0x108] sm:$0xff] %vm523_vm0, %v492_v37  ;;  %556 = vst.msk [vmem:[%s1253_s2 + $0x100] sm:$0xff] %vm523_vm0, %v491_v38 }
  0xc1   :  { %v317_v41 = vpop.permute.xlu1 %316  ;;  %v312_v42 = vpop.permute.xlu0 %311 }
  0xc2   :  { %v494_v43 = vmul.f32 %v317_v41, %v46_v39  ;;  %v493_v44 = vmul.f32 %v312_v42, %v45_v40  ;;  %v68_v41 = vld [vmem:[%s1252_s0 + $0x1c8] sm:$0xff]  ;;  %v67_v42 = vld [vmem:[%s1252_s0 + $0x1c0] sm:$0xff] }
  0xc4   :  { %559 = vst.msk [vmem:[%s1253_s2 + $0x118] sm:$0xff] %vm523_vm0, %v494_v43  ;;  %558 = vst.msk [vmem:[%s1253_s2 + $0x110] sm:$0xff] %vm523_vm0, %v493_v44 }
  0xc5   :  { %v327_v47 = vpop.permute.xlu1 %326  ;;  %v322_v48 = vpop.permute.xlu0 %321 }
  0xc6   :  { %v496_v49 = vmul.f32 %v327_v47, %v48_v45  ;;  %v495_v50 = vmul.f32 %v322_v48, %v47_v46  ;;  %v70_v47 = vld [vmem:[%s1252_s0 + $0x1d8] sm:$0xff]  ;;  %v69_v48 = vld [vmem:[%s1252_s0 + $0x1d0] sm:$0xff] }
  0xc8   :  { %561 = vst.msk [vmem:[%s1253_s2 + $0x128] sm:$0xff] %vm523_vm0, %v496_v49  ;;  %560 = vst.msk [vmem:[%s1253_s2 + $0x120] sm:$0xff] %vm523_vm0, %v495_v50 }
  0xc9   :  { %v337_v53 = vpop.permute.xlu1 %336  ;;  %v332_v54 = vpop.permute.xlu0 %331 }
  0xca   :  { %v498_v55 = vmul.f32 %v337_v53, %v50_v51  ;;  %v497_v56 = vmul.f32 %v332_v54, %v49_v52  ;;  %v72_v53 = vld [vmem:[%s1252_s0 + $0x1e8] sm:$0xff]  ;;  %v71_v54 = vld [vmem:[%s1252_s0 + $0x1e0] sm:$0xff] }
  0xcc   :  { %563 = vst.msk [vmem:[%s1253_s2 + $0x138] sm:$0xff] %vm523_vm0, %v498_v55  ;;  %562 = vst.msk [vmem:[%s1253_s2 + $0x130] sm:$0xff] %vm523_vm0, %v497_v56 }
  0xcd   :  { %v347_v59 = vpop.permute.xlu1 %346  ;;  %v342_v60 = vpop.permute.xlu0 %341 }
  0xce   :  { %v500_v61 = vmul.f32 %v347_v59, %v52_v57  ;;  %v499_v62 = vmul.f32 %v342_v60, %v51_v58  ;;  %v74_v59 = vld [vmem:[%s1252_s0 + $0x1f8] sm:$0xff]  ;;  %v73_v60 = vld [vmem:[%s1252_s0 + $0x1f0] sm:$0xff] }
  0xd0   :  { %565 = vst.msk [vmem:[%s1253_s2 + $0x148] sm:$0xff] %vm523_vm0, %v500_v61  ;;  %564 = vst.msk [vmem:[%s1253_s2 + $0x140] sm:$0xff] %vm523_vm0, %v499_v62 }
  0xd1   :  { %v357_v1 = vpop.permute.xlu1 %356  ;;  %v352_v2 = vpop.permute.xlu0 %351 }
  0xd2   :  { %v502_v3 = vmul.f32 %v357_v1, %v54_v63  ;;  %v501_v4 = vmul.f32 %v352_v2, %v53_v0 }
  0xd4   :  { %567 = vst.msk [vmem:[%s1253_s2 + $0x158] sm:$0xff] %vm523_vm0, %v502_v3  ;;  %566 = vst.msk [vmem:[%s1253_s2 + $0x150] sm:$0xff] %vm523_vm0, %v501_v4 }
  0xd5   :  { %v367_v7 = vpop.permute.xlu1 %366  ;;  %v362_v8 = vpop.permute.xlu0 %361 }
  0xd6   :  { %v504_v9 = vmul.f32 %v367_v7, %v56_v5  ;;  %v503_v10 = vmul.f32 %v362_v8, %v55_v6 }
  0xd8   :  { %569 = vst.msk [vmem:[%s1253_s2 + $0x168] sm:$0xff] %vm523_vm0, %v504_v9  ;;  %568 = vst.msk [vmem:[%s1253_s2 + $0x160] sm:$0xff] %vm523_vm0, %v503_v10 }
  0xd9   :  { %v377_v13 = vpop.permute.xlu1 %376  ;;  %v372_v14 = vpop.permute.xlu0 %371 }
  0xda   :  { %v506_v15 = vmul.f32 %v377_v13, %v58_v11  ;;  %v505_v16 = vmul.f32 %v372_v14, %v57_v12 }
  0xdc   :  { %571 = vst.msk [vmem:[%s1253_s2 + $0x178] sm:$0xff] %vm523_vm0, %v506_v15  ;;  %570 = vst.msk [vmem:[%s1253_s2 + $0x170] sm:$0xff] %vm523_vm0, %v505_v16 }
  0xdd   :  { %v387_v19 = vpop.permute.xlu1 %386  ;;  %v382_v20 = vpop.permute.xlu0 %381 }
  0xde   :  { %v508_v21 = vmul.f32 %v387_v19, %v60_v17  ;;  %v507_v22 = vmul.f32 %v382_v20, %v59_v18 }
  0xe0   :  { %573 = vst.msk [vmem:[%s1253_s2 + $0x188] sm:$0xff] %vm523_vm0, %v508_v21  ;;  %572 = vst.msk [vmem:[%s1253_s2 + $0x180] sm:$0xff] %vm523_vm0, %v507_v22 }
  0xe1   :  { %v397_v25 = vpop.permute.xlu1 %396  ;;  %v392_v26 = vpop.permute.xlu0 %391 }
  0xe2   :  { %v510_v27 = vmul.f32 %v397_v25, %v62_v23  ;;  %v509_v28 = vmul.f32 %v392_v26, %v61_v24 }
  0xe4   :  { %575 = vst.msk [vmem:[%s1253_s2 + $0x198] sm:$0xff] %vm523_vm0, %v510_v27  ;;  %574 = vst.msk [vmem:[%s1253_s2 + $0x190] sm:$0xff] %vm523_vm0, %v509_v28 }
  0xe5   :  { %v407_v31 = vpop.permute.xlu1 %406  ;;  %v402_v32 = vpop.permute.xlu0 %401 }
  0xe6   :  { %v512_v33 = vmul.f32 %v407_v31, %v64_v29  ;;  %v511_v34 = vmul.f32 %v402_v32, %v63_v30 }
  0xe8   :  { %577 = vst.msk [vmem:[%s1253_s2 + $0x1a8] sm:$0xff] %vm523_vm0, %v512_v33  ;;  %576 = vst.msk [vmem:[%s1253_s2 + $0x1a0] sm:$0xff] %vm523_vm0, %v511_v34 }
  0xe9   :  { %v417_v37 = vpop.permute.xlu1 %416  ;;  %v412_v38 = vpop.permute.xlu0 %411 }
  0xea   :  { %v514_v39 = vmul.f32 %v417_v37, %v66_v35  ;;  %v513_v40 = vmul.f32 %v412_v38, %v65_v36 }
  0xec   :  { %579 = vst.msk [vmem:[%s1253_s2 + $0x1b8] sm:$0xff] %vm523_vm0, %v514_v39  ;;  %578 = vst.msk [vmem:[%s1253_s2 + $0x1b0] sm:$0xff] %vm523_vm0, %v513_v40 }
  0xed   :  { %v427_v43 = vpop.permute.xlu1 %426  ;;  %v422_v44 = vpop.permute.xlu0 %421 }
  0xee   :  { %v516_v45 = vmul.f32 %v427_v43, %v68_v41  ;;  %v515_v46 = vmul.f32 %v422_v44, %v67_v42 }
  0xf0   :  { %581 = vst.msk [vmem:[%s1253_s2 + $0x1c8] sm:$0xff] %vm523_vm0, %v516_v45  ;;  %580 = vst.msk [vmem:[%s1253_s2 + $0x1c0] sm:$0xff] %vm523_vm0, %v515_v46 }
  0xf1   :  { %v437_v49 = vpop.permute.xlu1 %436  ;;  %v432_v50 = vpop.permute.xlu0 %431 }
  0xf2   :  { %v518_v51 = vmul.f32 %v437_v49, %v70_v47  ;;  %v517_v52 = vmul.f32 %v432_v50, %v69_v48 }
  0xf4   :  { %583 = vst.msk [vmem:[%s1253_s2 + $0x1d8] sm:$0xff] %vm523_vm0, %v518_v51  ;;  %582 = vst.msk [vmem:[%s1253_s2 + $0x1d0] sm:$0xff] %vm523_vm0, %v517_v52 }
  0xf5   :  { %v447_v55 = vpop.permute.xlu1 %446  ;;  %v442_v56 = vpop.permute.xlu0 %441 }
  0xf6   :  { %v520_v57 = vmul.f32 %v447_v55, %v72_v53  ;;  %v519_v58 = vmul.f32 %v442_v56, %v71_v54 }
  0xf8   :  { %585 = vst.msk [vmem:[%s1253_s2 + $0x1e8] sm:$0xff] %vm523_vm0, %v520_v57  ;;  %584 = vst.msk [vmem:[%s1253_s2 + $0x1e0] sm:$0xff] %vm523_vm0, %v519_v58 }
  0xf9   :  { %v457_v61 = vpop.permute.xlu1 %456  ;;  %v452_v62 = vpop.permute.xlu0 %451 }
  0xfa   :  { %v522_v63 = vmul.f32 %v457_v61, %v74_v59  ;;  %v521_v0 = vmul.f32 %v452_v62, %v73_v60 }
  0xfc   :  { %587 = vst.msk [vmem:[%s1253_s2 + $0x1f8] sm:$0xff] %vm523_vm0, %v522_v63  ;;  %586 = vst.msk [vmem:[%s1253_s2 + $0x1f0] sm:$0xff] %vm523_vm0, %v521_v0 }

</bundles_post_ra>
